<compile_context>
chip_gen: v7x
topology: tpu7x:2x2x1
jax: 0.10.0
libtpu: 0.0.40
codegen_flags: <defaults>
</compile_context>

<pallas_src>
import jax
import jax.numpy as jnp
from jax.experimental import pallas as pl
from jax.experimental.pallas import tpu as pltpu


def _round_up(x: int, m: int) -> int:
    return ((x + m - 1) // m) * m


def embedding_code(
    input_ids,
    emb_tables,
    *,
    row_tile: int = 512,
    mxu_align: int = 256,          # 256 for v6e/v7x (256x256 MXU); 128 suffices on v5e
    table_dtype=jnp.bfloat16,
    out_dtype=jnp.float32,         # set to bf16 when the consumer runs in bf16
    decode_bypass_rows: int = 64,
):
    """input_ids: [B, T] int; emb_tables: [num_vq, V, H] f32 -> [B, T, H] out_dtype."""
    B, T = input_ids.shape
    num_vq, V, H = emb_tables.shape
    BT = B * T

    # Shared-id semantics => pre-sum the codebooks (f32 accumulate, then cast).
    tbl_sum = jnp.sum(emb_tables.astype(jnp.float32), axis=0)         # [V, H]
    tbl_q = tbl_sum.astype(table_dtype)

    ids_flat = input_ids.reshape(BT).astype(jnp.int32)

    # Decode-sized calls: pallas_call/grid overhead + padded one-hot matmul
    # dwarf the real work -> a plain XLA gather is strictly cheaper.
    if BT <= decode_bypass_rows:
        out = jnp.take(tbl_q, ids_flat, axis=0).astype(out_dtype)     # [BT, H]
        return out.reshape(B, T, H)

    V_pad = _round_up(V, mxu_align)     # MXU-aligned contraction dim
    H_pad = _round_up(H, mxu_align)     # lane-dense, MXU-aligned output dim

    # Row tiling over B*T rows.
    rows = _round_up(BT, 8)
    TM = _round_up(min(row_tile, rows), 8)
    if rows // TM < 2 and rows > 8:
        # v7x megacore: make sure both TensorCores get at least one grid step.
        TM = _round_up(pl.cdiv(rows, 2), 8)
    BT_pad = _round_up(BT, TM)
    G = BT_pad // TM

    # ids: [BT_pad, 1] (padded rows read row 0; their output rows are sliced off).
    ids = jnp.pad(ids_flat, (0, BT_pad - BT))[:, None]

    # Pre-summed, padded, quantized table: [V_pad, H_pad].
    tbl = jnp.pad(tbl_q, ((0, V_pad - V), (0, H_pad - H)))

    # --- VMEM budget check (matters first on v7x: 64 MiB physical, 32 MiB scoped default).
    tbl_b = jnp.dtype(table_dtype).itemsize
    out_b = jnp.dtype(out_dtype).itemsize
    vmem_bytes = (
        2 * V_pad * H_pad * tbl_b        # resident table (2 pipeline buffers; DMA'd once)
        + 2 * TM * 4                     # ids tiles
        + TM * V_pad * (4 + tbl_b)       # int32 iota + one-hot intermediates
        + 2 * TM * H_pad * out_b         # output tiles
    )
    if vmem_bytes > 60 * 1024 * 1024:
        # TODO(synk): for very large vocab/hidden, tile the contraction dim with an extra
        # "arbitrary" grid axis + f32 VMEM accumulator instead of a fully resident table.
        raise ValueError(
            f"EmbeddingCode kernel needs ~{vmem_bytes / 2**20:.1f} MiB VMEM; "
            "reduce row_tile or tile the vocab dimension.")
    vmem_limit = (min(2 * vmem_bytes, 60 * 1024 * 1024)
                  if vmem_bytes > 28 * 1024 * 1024 else None)

    def kernel(ids_ref, tbl_ref, out_ref):
        ids_blk = ids_ref[...]                                          # [TM, 1] int32
        lane = jax.lax.broadcasted_iota(jnp.int32, (TM, V_pad), 1)      # [TM, V_pad]
        onehot = (lane == ids_blk).astype(tbl_ref.dtype)                # exact 0/1
        acc = jnp.dot(onehot, tbl_ref[...], preferred_element_type=jnp.float32)
        out_ref[...] = acc.astype(out_ref.dtype)

    cost = pl.CostEstimate(
        flops=2 * BT_pad * V_pad * H_pad,
        transcendentals=0,
        bytes_accessed=BT_pad * 4 + V_pad * H_pad * tbl_b + BT_pad * H_pad * out_b,
    )

    out = pl.pallas_call(
        kernel,
        out_shape=jax.ShapeDtypeStruct((BT_pad, H_pad), out_dtype),
        grid_spec=pltpu.PrefetchScalarGridSpec(
            num_scalar_prefetch=0,
            grid=(G,),
            in_specs=[
                pl.BlockSpec((TM, 1), lambda i: (i, 0)),          # ids row tile
                pl.BlockSpec((V_pad, H_pad), lambda i: (0, 0)),   # grid-invariant table
            ],
            out_specs=pl.BlockSpec((TM, H_pad), lambda i: (i, 0)),
        ),
        compiler_params=pltpu.CompilerParams(
            dimension_semantics=("parallel",),   # independent rows (2nd TC on v7x)
            vmem_limit_bytes=vmem_limit,
        ),
        cost_estimate=cost,
    )(ids, tbl)

    return out[:BT, :H].reshape(B, T, H)


if __name__ == "__main__":
    # Small synthetic config consistent with the module:
    B, T = 2, 8          # batch, sequence length
    num_vq = 4           # chat.pretrain_models['gpt'].num_vq
    V = 64               # per-codebook vocab (num_audio_tokens)
    H = 32               # hidden size of each nn.Embedding

    key = jax.random.PRNGKey(0)
    k_ids, k_tbl = jax.random.split(key)

    input_ids = jax.random.randint(k_ids, (B, T), 0, V, dtype=jnp.int32)
    emb_tables = jax.random.normal(k_tbl, (num_vq, V, H), dtype=jnp.float32)

    # Force the Pallas kernel path (the default routes tiny decode-sized BT
    # through the cheaper XLA-gather bypass).
    out = embedding_code(input_ids, emb_tables, decode_bypass_rows=0)
    out = jax.block_until_ready(out)

    # Pure-JAX reference with the same numerics as the kernel: codebooks summed
    # in f32, then the single bf16 table cast.
    ref_tbl = jnp.sum(emb_tables, axis=0).astype(jnp.bfloat16).astype(jnp.float32)
    ref = ref_tbl[input_ids]                     # [B, T, H]

    assert out.shape == (B, T, H)
    assert jnp.allclose(out, ref, atol=1e-4, rtol=1e-4)

    # Also exercise the decode bypass (default path at this tiny BT).
    out_bypass = jax.block_until_ready(embedding_code(input_ids, emb_tables))
    assert jnp.allclose(out_bypass, ref, atol=1e-4, rtol=1e-4)

    print("KERNEL_OK")
</pallas_src>

<mosaic_0001>
module attributes {stable_mosaic.version = 11 : i64} {
  func.func @kernel(%arg0: i32, %arg1: memref<8x1xi32, #tpu.memory_space<vmem>>, %arg2: memref<256x256xbf16, #tpu.memory_space<vmem>>, %arg3: memref<8x256xf32, #tpu.memory_space<vmem>>) attributes {dimension_semantics = [#tpu.dimension_semantics<parallel>], iteration_bounds = array<i64: 2>, scalar_prefetch = 0 : i64, scratch_operands = 0 : i64, tpu.core_type = #tpu.core_type<tc>, window_params = [{transform_indices = @transform_0, window_bounds = array<i64: 8, 1>}, {pipeline_mode = #tpu.pipeline_mode<synchronous>, transform_indices = @transform_1, window_bounds = array<i64: 256, 256>}, {transform_indices = @transform_2, window_bounds = array<i64: 8, 256>}]} {
    %c0 = arith.constant 0 : index
    %c0_0 = arith.constant 0 : index
    %0 = vector.load %arg1[%c0, %c0_0] : memref<8x1xi32, #tpu.memory_space<vmem>>, vector<8x1xi32>
    %1 = tpu.iota {dimensions = array<i32: 1>} : vector<8x256xi32>
    %2 = vector.broadcast %0 : vector<8x1xi32> to vector<8x256xi32>
    %3 = arith.cmpi eq, %1, %2 : vector<8x256xi32>
    %4 = arith.extui %3 : vector<8x256xi1> to vector<8x256xi32>
    %5 = arith.sitofp %4 : vector<8x256xi32> to vector<8x256xf32>
    %6 = arith.truncf %5 : vector<8x256xf32> to vector<8x256xbf16>
    %c0_1 = arith.constant 0 : index
    %c0_2 = arith.constant 0 : index
    %7 = vector.load %arg2[%c0_1, %c0_2] : memref<256x256xbf16, #tpu.memory_space<vmem>>, vector<256x256xbf16>
    %cst = arith.constant dense<0.000000e+00> : vector<8x256xf32>
    %8 = tpu.matmul %6, %7, %cst {dimension_numbers = #tpu.dot_dimension_numbers<[1], [0], [0], [1], [0, 0, 1, 1], [], []>} : vector<8x256xbf16>, vector<256x256xbf16>, vector<8x256xf32> -> vector<8x256xf32>
    %c0_3 = arith.constant 0 : index
    %c0_4 = arith.constant 0 : index
    %9 = vector.load %arg3[%c0_3, %c0_4] : memref<8x256xf32, #tpu.memory_space<vmem>>, vector<8x256xf32>
    tpu.vector_store %arg3[%c0_3, %c0_4], %8 {strides = array<i32>} : memref<8x256xf32, #tpu.memory_space<vmem>>, vector<8x256xf32>,
    return
  }
  func.func @transform_0(%arg0: i32) -> (i32, i32) {
    %c0_i32 = arith.constant 0 : i32
    %c0_i32_0 = arith.constant 0 : i32
    return %arg0, %c0_i32 : i32, i32
  }
  func.func @transform_1(%arg0: i32) -> (i32, i32) {
    %c0_i32 = arith.constant 0 : i32
    %c0_i32_0 = arith.constant 0 : i32
    %c0_i32_1 = arith.constant 0 : i32
    return %c0_i32, %c0_i32_0 : i32, i32
  }
  func.func @transform_2(%arg0: i32) -> (i32, i32) {
    %c0_i32 = arith.constant 0 : i32
    %c0_i32_0 = arith.constant 0 : i32
    return %arg0, %c0_i32 : i32, i32
  }
}

</mosaic_0001>

<bundles_post_ra>
// kernel: tpu_custom_call.1
= control target key start
LH: loop header
LB: loop body
LE: loop exit
PB: predicated region body
PF: predicated region fallthrough
CT: control target
= control target key end

     0   :  { %7 = vsyncpa [#allocation3], 0  ;;  %s897_s0 = inlined_call_operand.vmem [shape: s32[16,1], index: 0, kind: input, shape index: {}]   ;;  %s898_s1 = inlined_call_operand.hbm [shape: bf16[256,256], index: 1, kind: input, shape index: {}]   ;;  %s899_s2 = inlined_call_operand.hbm [shape: f32[16,256], index: 2, kind: output, shape index: {}]  }
   0x1   :  { %8 = vsyncpa [#allocation4], 0 }
   0x2   :  { %10 = vsyncpa [#allocation4 + $0x1], 0  ;;  %s762_s9 = smov 0   ;;  %s764_s10 = smov 0  }
   0x3   :  { %s766_s11 = smov 0   ;;  %s768_s12 = smov 0  }
   0x4 LB: > { %s783_s13 = sadd.s32 4294967295, %s739_s12   ;;  %s490_s14 = sadd.s32 4294967294, %s739_s12   ;;  %s739_s12 = sphi %s768_s12, %s915_s12   ;;  %s735_s11 = sphi %s766_s11, %s914_s11   ;;  %s731_s10 = sphi %s764_s10, %s913_s10   ;;  %s727_s9 = sphi %s762_s9, %s912_s9  }
   0x5   : > { %s787_s15 = sadd.s32 1, %s739_s12   ;;  %s70_s16 = sadd.s32 1, %s735_s11 }
   0x6   : > { %s67_s17 = ssub.s32 %s739_s12, %s787_s15  ;;  %p80_p0 = scmp.ne.s32.totalorder %s735_s11, %s731_s10 }
   0x7   : > { %p68_p1 = scmp.eq.s32.totalorder %s67_s17, 0  ;;  %p81_p2 = scmp.eq.s32.totalorder %s783_s13, 1 }
   0x8   : > { %p86_p3 = scmp.ne.s32.totalorder %s731_s10, %s727_s9  ;;  %p87_p4 = scmp.eq.s32.totalorder %s490_s14, 1 }
   0x9   : > { %s798_s18 = scalar_select %p68_p1, %s735_s11, %s70_s16  }
   0xa   : > { %p800_p5 = por %p81_p2, %p80_p0  ;;  %p804_p6 = por %p87_p4, %p86_p3 }
   0xb   : > { %p491_p7 = scmp.ge.s32.totalorder %s739_s12, 1  ;;  %p94_p8 = scmp.lt.s32.totalorder %s739_s12, 3 }
   0xc   : > { %s903_s19 = scalar_select %p800_p5, 1, 0 }
   0xd   : > { %s904_s20 = scalar_select %p804_p6, 1, 0 }
   0xe   : > { %p900_p9 = scmp.eq.s32.totalorder %s783_s13, 0  ;;  %p811_p10 = pnand %p491_p7, %p94_p8 }
   0xf   : > { %s741_s22 = smov [#allocation2]   ;;  %s645_s27 = scalar_lea.hbm %s898_s1, 4096 }
  0x10   : > { %s905_s21 = scalar_select %p811_p10, 1, 0 }
  0x11   : > { %s106_s23 = sshll.u32 %s741_s22, 4  ;;  %p548_p11 = pneg %p811_p10  ;;  %s107_s23 = int_to_ptr.vmem [resolvable:$true] %s106_s23 }
  0x12   : > { %p646_p13 = scmp.ne.s32.totalorder %s898_s1, %s645_s27  ;;  %p652_p3 = scmp.lt.u32.totalorder %s645_s27, %s898_s1 }
  0x13   : > { %p819_p12 = pnand %p900_p9, %p548_p11 }
  0x15   : > { %p647_p0 = pneg %p819_p12 }
  0x17   : > { %p648_p1 = pnand %p647_p0, %p646_p13 }
  0x19   : > { %p649_p2 = pneg %p648_p1 }
  0x1b   : > { %p654_p4 = pnand %p652_p3, %p649_p2 }
  0x1d   : > { %657 = shalt.err (!%p654_p4)
}
  0x1e   : > { %s658_s4 = scalar_lea.vmem %s107_s23, 4096  ;;  %p666_p9 = scmp.lt.s32.totalorder %s107_s23, %s107_s23 }
  0x1f   : > { %p659_p7 = scmp.ne.s32.totalorder %s107_s23, %s658_s4  ;;  %p667_p6 = scmp.lt.s32.totalorder %s658_s4, %s658_s4 }
  0x21   : > { %p661_p8 = pnand %p659_p7, %p647_p0  ;;  %p668_p5 = por %p667_p6, %p666_p9 }
  0x23   : > { %p662_p11 = pneg %p661_p8 }
  0x25   : > { %p669_p10 = pnand %p668_p5, %p662_p11 }
  0x27   : > { %672 = shalt.err (!%p669_p10)
}
  0x28   : > { %s742_s5 = smov 128   ;;  %s743_s6 = smov 8  }
  0x29   : > { %551 = dma.hbm_to_vmem [thread:$0]  (!%p819_p12), %s898_s1, 4096, %s107_s23, [#allocation3], %s742_s5, %s742_s5, %s743_s6  }
  0x2a   : > { %p907_p13 = scmp.ne.s32.totalorder %s905_s21, 0 }
  0x2b   : > { %p908_p1 = scmp.eq.s32.totalorder (!%p907_p13), %s783_s13, 0 }
  0x2c   : > { %129 = sbr.rel (%p907_p13) target bundleno = 419 (0x1a3), region = 28 }
  0x33   : > { %718 = dma.done.wait (%p908_p1), [#allocation3], 4096   ;;  %p909_p0 = pmov %p908_p1 }
  0x34   : > { %p150_p5 = scmp.lt.s32.totalorder %s783_s13, 1  ;;  %v744_v0 = vmov 0   ;;  %v597_v2 = vld [vmem:[#allocation2 + $0x4] ss:$8 sps:$4 sm:$0xff]   ;;  %v599_v3 = vld [vmem:[#allocation2] ss:$8 sps:$4 sm:$0xff]   ;;  %v155_v34 = vlaneseq }
  0x35   : > { %720 = vsyncadd (%p909_p0), [#allocation3], 4294963200  ;;  %596 = vset.pattern.permute.xlu0 %v744_v0  ;;  %v600_v4 = vld [vmem:[#allocation2 + $0x14] ss:$8 sps:$4 sm:$0xff]   ;;  %361 = vmatprep.subr.bf16.mxu0 %v597_v2  ;;  %v602_v5 = vld [vmem:[#allocation2 + $0x10] ss:$8 sps:$4 sm:$0xff]  }
  0x36   : > { %s151_s14 = scalar_select %p150_p5, %s783_s13, 1  ;;  %362 = vmatpush1.bf16.msra.mxu0 %v599_v3  ;;  %v603_v6 = vld [vmem:[#allocation2 + $0x24] ss:$8 sps:$4 sm:$0xff]   ;;  %v605_v7 = vld [vmem:[#allocation2 + $0x20] ss:$8 sps:$4 sm:$0xff]   ;;  %v156_v35 = vand.u32 127, %v155_v34 }
  0x37   : > { %363 = vmatprep.subr.bf16.mxu0 %v600_v4  ;;  %v606_v8 = vld [vmem:[#allocation2 + $0x34] ss:$8 sps:$4 sm:$0xff]   ;;  %v608_v9 = vld [vmem:[#allocation2 + $0x30] ss:$8 sps:$4 sm:$0xff]   ;;  %v609_v10 = vld [vmem:[#allocation2 + $0x44] ss:$8 sps:$4 sm:$0xff]  }
  0x38   : > { %s497_s16 = sshll.u32 %s151_s14, 3  ;;  %v611_v11 = vld [vmem:[#allocation2 + $0x40] ss:$8 sps:$4 sm:$0xff]   ;;  %v612_v12 = vld [vmem:[#allocation2 + $0x54] ss:$8 sps:$4 sm:$0xff]   ;;  %v157_v36 = vadd.s32 128, %v156_v35 }
  0x39   : > { %s153_s23 = scalar_lea.vmem %s897_s0, %s497_s16  ;;  %v614_v13 = vld [vmem:[#allocation2 + $0x50] ss:$8 sps:$4 sm:$0xff]   ;;  %v615_v14 = vld [vmem:[#allocation2 + $0x64] ss:$8 sps:$4 sm:$0xff]   ;;  %v617_v15 = vld [vmem:[#allocation2 + $0x60] ss:$8 sps:$4 sm:$0xff]  }
  0x3a   : > { %v154_v1 = vld [vmem:[%s153_s23] sm:$0xff]  ;;  %364 = vmatpush1.bf16.msra.mxu0 %v602_v5  ;;  %v618_v16 = vld [vmem:[#allocation2 + $0x74] ss:$8 sps:$4 sm:$0xff]   ;;  %v620_v17 = vld [vmem:[#allocation2 + $0x70] ss:$8 sps:$4 sm:$0xff]   ;;  %s147_s21 = sand.u32 1, %s731_s10  }
  0x3b   : > { %159 = vperm.xlu0 %596, %v154_v1   ;;  %365 = vmatprep.subr.bf16.mxu0 %v603_v6  ;;  %v621_v18 = vld [vmem:[#allocation2 + $0x84] ss:$8 sps:$4 sm:$0xff]   ;;  %v623_v19 = vld [vmem:[#allocation2 + $0x80] ss:$8 sps:$4 sm:$0xff]   ;;  %v624_v20 = vld [vmem:[#allocation2 + $0x94] ss:$8 sps:$4 sm:$0xff]  }
  0x3c   : > { %v626_v21 = vld [vmem:[#allocation2 + $0x90] ss:$8 sps:$4 sm:$0xff]   ;;  %v627_v22 = vld [vmem:[#allocation2 + $0xa4] ss:$8 sps:$4 sm:$0xff]   ;;  %v629_v23 = vld [vmem:[#allocation2 + $0xa0] ss:$8 sps:$4 sm:$0xff]  }
  0x3d   : > { %v630_v24 = vld [vmem:[#allocation2 + $0xb4] ss:$8 sps:$4 sm:$0xff]   ;;  %v632_v25 = vld [vmem:[#allocation2 + $0xb0] ss:$8 sps:$4 sm:$0xff]   ;;  %v633_v26 = vld [vmem:[#allocation2 + $0xc4] ss:$8 sps:$4 sm:$0xff]  }
  0x3e   : > { %366 = vmatpush1.bf16.msra.mxu0 %v605_v7  ;;  %v635_v27 = vld [vmem:[#allocation2 + $0xc0] ss:$8 sps:$4 sm:$0xff]   ;;  %v636_v28 = vld [vmem:[#allocation2 + $0xd4] ss:$8 sps:$4 sm:$0xff]   ;;  %v638_v29 = vld [vmem:[#allocation2 + $0xd0] ss:$8 sps:$4 sm:$0xff]  }
  0x3f   : > { %367 = vmatprep.subr.bf16.mxu0 %v606_v8  ;;  %v639_v30 = vld [vmem:[#allocation2 + $0xe4] ss:$8 sps:$4 sm:$0xff]   ;;  %v641_v31 = vld [vmem:[#allocation2 + $0xe0] ss:$8 sps:$4 sm:$0xff]   ;;  %v642_v32 = vld [vmem:[#allocation2 + $0xf4] ss:$8 sps:$4 sm:$0xff]  }
  0x40   : > { %v644_v33 = vld [vmem:[#allocation2 + $0xf0] ss:$8 sps:$4 sm:$0xff]   ;;  %v745_v38 = vmov 1.0|1.0   ;;  %s496_s24 = sshll.u32 %s147_s21, 4  ;;  %s541_s27 = sshll.u32 %s783_s13, 8 }
  0x41   : > { %s149_s25 = scalar_lea.vmem [#allocation5], %s496_s24  ;;  %s857_s30 = scalar_lea.hbm %s899_s2, %s541_s27 }
  0x42   : > { %368 = vmatpush1.bf16.msra.mxu0 %v608_v9  ;;  %s419_s26 = sshll.u32 %s149_s25, 4  ;;  %s405_s3 = scalar_lea.sflag [#allocation4], %s147_s21  ;;  %s852_s26 = int_to_ptr.vmem [resolvable:$true] %s419_s26 }
  0x43   : > { %369 = vmatprep.subr.bf16.mxu0 %v609_v10  ;;  %s673_s4 = scalar_lea.vmem %s852_s26, 256  ;;  %p910_p9 = scmp.ne.s32.totalorder %s903_s19, 0 }
  0x44   : > { %p674_p6 = scmp.ne.s32.totalorder %s852_s26, %s673_s4  ;;  %s746_s13 = smov [#allocation5]  }
  0x45   : > { %s677_s5 = sshll.u32 %s746_s13, 4  ;;  %s678_s5 = int_to_ptr.vmem [resolvable:$false] %s677_s5 }
  0x46   : > { %370 = vmatpush1.bf16.msra.mxu0 %v611_v11  ;;  %p675_p10 = pnand %p674_p6, %p910_p9  ;;  %s679_s6 = scalar_lea.vmem %s678_s5, 512 }
  0x47   : > { %371 = vmatprep.subr.bf16.mxu0 %v612_v12  ;;  %p680_p2 = scmp.lt.s32.totalorder %s852_s26, %s678_s5  ;;  %p681_p3 = scmp.lt.s32.totalorder %s679_s6, %s673_s4 }
  0x48   : > { %p676_p12 = pneg %p675_p10 }
  0x49   : > { %p682_p4 = por %p681_p3, %p680_p2 }
  0x4a   : > { %372 = vmatpush1.bf16.msra.mxu0 %v614_v13 }
  0x4b   : > { %373 = vmatprep.subr.bf16.mxu0 %v615_v14  ;;  %p683_p7 = pnand %p682_p4, %p676_p12 }
  0x4e   : > { %374 = vmatpush1.bf16.msra.mxu0 %v617_v15 }
  0x4f   : > { %375 = vmatprep.subr.bf16.mxu0 %v618_v16 }
  0x52   : > { %376 = vmatpush1.bf16.msra.mxu0 %v620_v17 }
  0x53   : > { %377 = vmatprep.subr.bf16.mxu0 %v621_v18 }
  0x56   : > { %378 = vmatpush1.bf16.msra.mxu0 %v623_v19 }
  0x57   : > { %379 = vmatprep.subr.bf16.mxu0 %v624_v20 }
  0x5a   : > { %380 = vmatpush1.bf16.msra.mxu0 %v626_v21 }
  0x5b   : > { %381 = vmatprep.subr.bf16.mxu0 %v627_v22 }
  0x5e   : > { %382 = vmatpush1.bf16.msra.mxu0 %v629_v23 }
  0x5f   : > { %383 = vmatprep.subr.bf16.mxu0 %v630_v24 }
  0x62   : > { %384 = vmatpush1.bf16.msra.mxu0 %v632_v25 }
  0x63   : > { %385 = vmatprep.subr.bf16.mxu0 %v633_v26 }
  0x66   : > { %386 = vmatpush1.bf16.msra.mxu0 %v635_v27 }
  0x67   : > { %387 = vmatprep.subr.bf16.mxu0 %v636_v28 }
  0x6a   : > { %388 = vmatpush1.bf16.msra.mxu0 %v638_v29 }
  0x6b   : > { %389 = vmatprep.subr.bf16.mxu0 %v639_v30 }
  0x6e   : > { %390 = vmatpush1.bf16.msra.mxu0 %v641_v31 }
  0x6f   : > { %391 = vmatprep.subr.bf16.mxu0 %v642_v32 }
  0x72   : > { %392 = vmatpush1.bf16.msra.mxu0 %v644_v33 }
  0xba   : > { %v160_v37 = vpop.permute.xlu0 %159 }
  0xbb   : > { %vm161_vm0 = vcmp.eq.s32.totalorder %v156_v35, %v160_v37  ;;  %vm162_vm1 = vcmp.eq.s32.totalorder %v157_v36, %v160_v37 }
  0xbc   : > { %vm534_vm2 = vmpackc.low %vm161_vm0, %vm161_vm0 }
  0xbd   : > { %vm532_vm3 = vmpackc.low %vm162_vm1, %vm162_vm1 }
  0xbe   : > { %533 = vmatprep.mubr.msk.bf16.mxu0 %vm532_vm3, %v745_v38 }
  0xbf   : > { %535 = vmatmul.mubr.msk.bf16.vlgmr.msra.gmra.mrb[0].mxu0 %vm534_vm2, %v745_v38 }
 0x192   : > { %v395_v39 = vpop.f32.mrb[0].mxu0 }
 0x193   : > { %402 = vst [vmem:[%s149_s25] sm:$0xff] %v395_v39  ;;  %v397_v40 = vpop.f32.mrb[1].mxu0 }
 0x194   : > { %403 = vst [vmem:[%s149_s25 + $0x8] sm:$0xff] %v397_v40  ;;  %v399_v41 = vpop.f32.mrb[2].mxu0 }
 0x195   : > { %v400_v42 = vpop.f32.mrb[3].mxu0 }
 0x196   : > { %686 = shalt.err (!%p683_p7)
}
 0x197   : > { %s687_s7 = scalar_lea.hbm %s857_s30, 256  ;;  %s691_s16 = scalar_lea.hbm %s899_s2, 512 }
 0x198   : > { %p688_p8 = scmp.ne.s32.totalorder %s857_s30, %s687_s7  ;;  %p692_p1 = scmp.lt.u32.totalorder %s857_s30, %s899_s2 }
 0x199   : > { %p693_p0 = scmp.lt.u32.totalorder %s691_s16, %s687_s7  ;;  %p695_p6 = scmp.lt.u32.totalorder %s687_s7, %s857_s30 }
 0x19a   : > { %p689_p11 = pnand %p688_p8, %p910_p9 }
 0x19b   : > { %p694_p5 = por %p693_p0, %p692_p1 }
 0x19c   : > { %p690_p13 = pneg %p689_p11 }
 0x19d   : > { %p696_p10 = por %p695_p6, %p694_p5 }
 0x19f   : > { %p697_p12 = pnand %p696_p10, %p690_p13 }
 0x1a1   : > { %700 = shalt.err (!%p697_p12)
}
 0x1a2   : > { %546 = dma.vmem_to_hbm [thread:$0]  (%p910_p9), %s852_s26, 256, %s857_s30, %s405_s3  }
 0x1a3 PF: > { %p558_p2 = scmp.ge.s32.totalorder %s739_s12, 2  ;;  %s431_s23 = sand.u32 1, %s727_s9  }
 0x1a4   : > { %p911_p3 = scmp.ne.s32.totalorder %s904_s20, 0  ;;  %s432_s21 = scalar_lea.sflag [#allocation4], %s431_s23 }
 0x1a6   : > { %p553_p4 = pnand %p558_p2, %p911_p3 }
 0x1a8   : > { %722 = dma.done.wait (!%p553_p4), %s432_s21, 256  }
 0x1a9   : > { %724 = vsyncadd (!%p553_p4), %s432_s21, 4294967040  ;;  %p13_p7 = scmp.ge.s32.totalorder %s787_s15, 4   ;;  %s912_s9 = smov %s731_s10 }
 0x1aa   : > { %s913_s10 = smov %s735_s11  ;;  %s914_s11 = smov %s798_s18 }
 0x1ab   : > { %s915_s12 = smov %s787_s15  ;;  %15 = sbr.rel (!%p13_p7) target bundleno = 4 (0x4), region = 68 }
 0x1b2   :  { %437 = vsyncpa [#allocation3], 1 }
 0x1b3   :  { %439 = vsyncpa [#allocation3 + $0x1], 1 }
 0x1b4   :  { %440 = vsyncpa [#allocation4], 1 }
 0x1b5   :  { %442 = vsyncpa [#allocation4 + $0x1], 1 }

</bundles_post_ra>
